<compile_context>
chip_gen: v7x
topology: tpu7x:2x2x1
jax: 0.10.0
libtpu: 0.0.40
codegen_flags: <defaults>
</compile_context>

<pallas_src>
import jax
import jax.numpy as jnp
from jax.experimental import pallas as pl
from jax.experimental.pallas import tpu as pltpu


def _spose_id_kernel(x_ref, w_ref, emb_ref, ids_ref, o_ref):
    # x_ref:   (tm, K)   bf16  -- activation tile (streams over batch)
    # w_ref:   (tn, K)   bf16  -- fc.weight tile, original (out, in) layout (resident)
    # emb_ref: (P, tn)   f32   -- embedding table tile (resident)
    # ids_ref: (tm, 1)   i32   -- participant ids for this batch tile
    # o_ref:   (tm, tn)  f32
    fx = jax.lax.dot_general(
        x_ref[...], w_ref[...],
        dimension_numbers=(((1,), (1,)), ((), ())),   # x @ W.T without any transpose op
        preferred_element_type=jnp.float32,
    )                                                 # (tm, tn) f32

    # Fused embedding gather: exact 0/1 one-hot rows times the f32 table on the MXU.
    ids = ids_ref[...]                                # (tm, 1) i32
    p = emb_ref.shape[0]
    onehot = (ids == jax.lax.broadcasted_iota(jnp.int32, (ids.shape[0], p), 1))
    slopes = jnp.dot(onehot.astype(jnp.float32), emb_ref[...],
                     preferred_element_type=jnp.float32)   # (tm, tn) f32

    o_ref[...] = (slopes * fx).astype(o_ref.dtype)


def _round_up(v, m):
    return (v + m - 1) // m * m


def _pick_tn(o_pad, tm, k, p, budget_bytes):
    """Largest lane-aligned out tile whose double-buffered working set fits VMEM."""
    for cand in (512, 256, 128):
        if o_pad % cand:
            continue
        vmem = 2 * (tm * k * 2          # x tile (bf16)
                    + cand * k * 2      # W tile (bf16)
                    + p * cand * 4      # emb tile (f32)
                    + tm * 128 * 4      # ids tile (padded lane)
                    + tm * cand * 4)    # out tile (f32)
        if vmem <= budget_bytes:
            return cand
    return 128


@jax.jit
def spose_id_forward(x, fc_weight, emb_weight, ids):
    """x: (B, in) f32; fc_weight: (out, in) f32; emb_weight: (P, out) f32; ids: (B,) i32."""
    B, in_size = x.shape
    out_size = fc_weight.shape[0]
    P = emb_weight.shape[0]

    # ---- tile selection --------------------------------------------------------
    if B >= 128:
        tm = 256 if (B % 256 == 0) else 128
        B_pad = _round_up(B, tm)
    else:                       # small batches: one sublane-aligned batch tile
        tm = _round_up(B, 8)
        B_pad = tm

    O_pad = _round_up(out_size, 128)     # lane-dense output stores
    tn = _pick_tn(O_pad, tm, in_size, P, budget_bytes=24 * 1024 * 1024)

    # ---- operand prep (bf16 MXU feed; in real use W would be stored bf16 at init) ----
    x_bf = x.astype(jnp.bfloat16)
    w_bf = fc_weight.astype(jnp.bfloat16)
    emb = emb_weight
    ids2 = ids.astype(jnp.int32).reshape(B, 1)
    if B_pad != B:
        x_bf = jnp.pad(x_bf, ((0, B_pad - B), (0, 0)))
        ids2 = jnp.pad(ids2, ((0, B_pad - B), (0, 0)))   # padded rows -> id 0 (sliced off)
    if O_pad != out_size:
        w_bf = jnp.pad(w_bf, ((0, O_pad - out_size), (0, 0)))
        emb = jnp.pad(emb, ((0, 0), (0, O_pad - out_size)))

    grid = (O_pad // tn, B_pad // tm)   # batch axis innermost -> W / emb tiles stay resident

    flops = int(2 * B_pad * in_size * O_pad + 2 * B_pad * P * O_pad)
    bytes_accessed = int(
        x_bf.size * 2 + w_bf.size * 2 + emb.size * 4
        + ids2.size * 4 + B_pad * O_pad * 4
    )

    out = pl.pallas_call(
        _spose_id_kernel,
        out_shape=jax.ShapeDtypeStruct((B_pad, O_pad), jnp.float32),
        grid_spec=pltpu.PrefetchScalarGridSpec(
            num_scalar_prefetch=0,
            grid=grid,
            in_specs=[
                pl.BlockSpec((tm, in_size), lambda j, i: (i, 0)),   # x         (streams)
                pl.BlockSpec((tn, in_size), lambda j, i: (j, 0)),   # fc.weight (resident over i)
                pl.BlockSpec((P, tn),       lambda j, i: (0, j)),   # emb table (resident over i)
                pl.BlockSpec((tm, 1),       lambda j, i: (i, 0)),   # ids       (streams)
            ],
            out_specs=pl.BlockSpec((tm, tn), lambda j, i: (i, j)),
        ),
        compiler_params=pltpu.CompilerParams(
            dimension_semantics=("parallel", "parallel"),   # both axes independent (megacore)
            vmem_limit_bytes=32 * 1024 * 1024,              # safe on v5e/v6e/v7x
        ),
        cost_estimate=pl.CostEstimate(
            flops=flops, transcendentals=0, bytes_accessed=bytes_accessed),
    )(x_bf, w_bf, emb, ids2)

    return out[:B, :out_size]


if __name__ == "__main__":
    # Small shapes consistent with the module (SPoSE latent dim < 128 exercises the
    # out-padding path; B=10 exercises the batch-padding path).
    B = 10
    in_size = 32
    out_size = 50
    num_participants = 16

    key = jax.random.PRNGKey(0)
    k_x, k_fc, k_emb, k_id = jax.random.split(key, 4)

    # Deterministic parameter init mirroring _initialize_weights():
    #   Linear weight  ~ N(0.1, 0.01), shape (out_size, in_size)
    #   Embedding      ~ N(0.5, 0.15), shape (num_participants, out_size)
    fc_weight = 0.1 + 0.01 * jax.random.normal(k_fc, (out_size, in_size), jnp.float32)
    emb_weight = 0.5 + 0.15 * jax.random.normal(k_emb, (num_participants, out_size), jnp.float32)

    x = jax.random.normal(k_x, (B, in_size), jnp.float32)
    ids = jax.random.randint(k_id, (B,), 0, num_participants, jnp.int32)

    out = jax.block_until_ready(spose_id_forward(x, fc_weight, emb_weight, ids))

    # Reference (plain JAX) mirroring the kernel's bf16-operand / f32-accumulate matmul.
    fx_ref = jax.lax.dot_general(
        x.astype(jnp.bfloat16), fc_weight.astype(jnp.bfloat16),
        dimension_numbers=(((1,), (1,)), ((), ())),
        preferred_element_type=jnp.float32)
    ref = jnp.take(emb_weight, ids, axis=0) * fx_ref

    assert out.shape == (B, out_size)
    assert jnp.allclose(out, ref, atol=1e-3, rtol=1e-3), "mismatch vs reference"

    print("KERNEL_OK")
</pallas_src>

<mosaic_0001>
module attributes {stable_mosaic.version = 11 : i64} {
  func.func @_spose_id_kernel(%arg0: i32, %arg1: i32, %arg2: memref<16x32xbf16, #tpu.memory_space<vmem>>, %arg3: memref<128x32xbf16, #tpu.memory_space<vmem>>, %arg4: memref<16x128xf32, #tpu.memory_space<vmem>>, %arg5: memref<16x1xi32, #tpu.memory_space<vmem>>, %arg6: memref<16x128xf32, #tpu.memory_space<vmem>>) attributes {dimension_semantics = [#tpu.dimension_semantics<parallel>, #tpu.dimension_semantics<parallel>], iteration_bounds = array<i64: 1, 1>, scalar_prefetch = 0 : i64, scratch_operands = 0 : i64, tpu.core_type = #tpu.core_type<tc>, window_params = [{transform_indices = @transform_0, window_bounds = array<i64: 16, 32>}, {transform_indices = @transform_1, window_bounds = array<i64: 128, 32>}, {transform_indices = @transform_2, window_bounds = array<i64: 16, 128>}, {transform_indices = @transform_3, window_bounds = array<i64: 16, 1>}, {transform_indices = @transform_4, window_bounds = array<i64: 16, 128>}]} {
    %c0 = arith.constant 0 : index
    %c0_0 = arith.constant 0 : index
    %0 = vector.load %arg2[%c0, %c0_0] : memref<16x32xbf16, #tpu.memory_space<vmem>>, vector<16x32xbf16>
    %c0_1 = arith.constant 0 : index
    %c0_2 = arith.constant 0 : index
    %1 = vector.load %arg3[%c0_1, %c0_2] : memref<128x32xbf16, #tpu.memory_space<vmem>>, vector<128x32xbf16>
    %cst = arith.constant dense<0.000000e+00> : vector<16x128xf32>
    %2 = tpu.matmul %0, %1, %cst {dimension_numbers = #tpu.dot_dimension_numbers<[1], [1], [0], [0], [0, 0, 1, 0], [], []>} : vector<16x32xbf16>, vector<128x32xbf16>, vector<16x128xf32> -> vector<16x128xf32>
    %c0_3 = arith.constant 0 : index
    %c0_4 = arith.constant 0 : index
    %3 = vector.load %arg5[%c0_3, %c0_4] : memref<16x1xi32, #tpu.memory_space<vmem>>, vector<16x1xi32>
    %4 = tpu.iota {dimensions = array<i32: 1>} : vector<16x16xi32>
    %5 = vector.broadcast %3 : vector<16x1xi32> to vector<16x16xi32>
    %6 = arith.cmpi eq, %5, %4 : vector<16x16xi32>
    %7 = arith.extui %6 : vector<16x16xi1> to vector<16x16xi32>
    %8 = arith.sitofp %7 : vector<16x16xi32> to vector<16x16xf32>
    %c0_5 = arith.constant 0 : index
    %c0_6 = arith.constant 0 : index
    %9 = vector.load %arg4[%c0_5, %c0_6] : memref<16x128xf32, #tpu.memory_space<vmem>>, vector<16x128xf32>
    %cst_7 = arith.constant dense<0.000000e+00> : vector<16x128xf32>
    %10 = tpu.matmul %8, %9, %cst_7 {dimension_numbers = #tpu.dot_dimension_numbers<[1], [0], [0], [1], [0, 0, 1, 1], [], []>} : vector<16x16xf32>, vector<16x128xf32>, vector<16x128xf32> -> vector<16x128xf32>
    %11 = arith.mulf %10, %2 : vector<16x128xf32>
    %c0_8 = arith.constant 0 : index
    %c0_9 = arith.constant 0 : index
    %12 = vector.load %arg6[%c0_8, %c0_9] : memref<16x128xf32, #tpu.memory_space<vmem>>, vector<16x128xf32>
    tpu.vector_store %arg6[%c0_8, %c0_9], %11 {strides = array<i32>} : memref<16x128xf32, #tpu.memory_space<vmem>>, vector<16x128xf32>,
    return
  }
  func.func @transform_0(%arg0: i32, %arg1: i32) -> (i32, i32) {
    %c0_i32 = arith.constant 0 : i32
    %c0_i32_0 = arith.constant 0 : i32
    return %arg1, %c0_i32 : i32, i32
  }
  func.func @transform_1(%arg0: i32, %arg1: i32) -> (i32, i32) {
    %c0_i32 = arith.constant 0 : i32
    %c0_i32_0 = arith.constant 0 : i32
    return %arg0, %c0_i32 : i32, i32
  }
  func.func @transform_2(%arg0: i32, %arg1: i32) -> (i32, i32) {
    %c0_i32 = arith.constant 0 : i32
    %c0_i32_0 = arith.constant 0 : i32
    return %c0_i32, %arg0 : i32, i32
  }
  func.func @transform_3(%arg0: i32, %arg1: i32) -> (i32, i32) {
    %c0_i32 = arith.constant 0 : i32
    %c0_i32_0 = arith.constant 0 : i32
    return %arg1, %c0_i32 : i32, i32
  }
  func.func @transform_4(%arg0: i32, %arg1: i32) -> (i32, i32) {
    %c0_i32 = arith.constant 0 : i32
    return %arg1, %arg0 : i32, i32
  }
}

</mosaic_0001>

<bundles_post_ra>
// kernel: spose_id_forward.1
= control target key start
LH: loop header
LB: loop body
LE: loop exit
PB: predicated region body
PF: predicated region fallthrough
CT: control target
= control target key end

     0   :  { %v369_v1 = vmov 0   ;;  %v370_v2 = vmov 0.0   ;;  %vm82_vm0 = vcmask 261120   ;;  %vm371_vm1 = vmmov 0   ;;  %s460_s0 = inlined_call_operand.vmem [shape: bf16[16,32], index: 0, kind: input, shape index: {}]   ;;  %s461_s1 = inlined_call_operand.vmem [shape: bf16[128,32], index: 1, kind: input, shape index: {}]   ;;  %s462_s2 = inlined_call_operand.vmem [shape: f32[16,128], index: 2, kind: input, shape index: {}]   ;;  %s463_s3 = inlined_call_operand.vmem [shape: s32[16,1], index: 3, kind: input, shape index: {}]   ;;  %s464_s4 = inlined_call_operand.hbm [shape: f32[16,128], index: 4, kind: output, shape index: {}]  }
   0x1   :  { %v151_v0 = vld [vmem:[%s463_s3] sm:$0xff]  ;;  %335 = vset.pattern.permute.xlu0 %v369_v1  ;;  %298 = vmatprep.subr.bf16.mxu0 %v370_v2  ;;  %v152_v4 = vld [vmem:[%s463_s3 + $0x8] sm:$0xff] }
   0x2   :  { %v336_v3 = vld [vmem:[%s461_s1] sm:$0xff]   ;;  %156 = vperm.xlu0 %335, %v151_v0   ;;  %v337_v6 = vld [vmem:[%s461_s1 + $0x8] sm:$0xff]   ;;  %314 = vmatprep.mubr.msk.bf16.mxu0 %vm371_vm1, %v370_v2 }
   0x3   :  { %v87_v5 = vsel %vm82_vm0, %v336_v3, 0  ;;  %v90_v7 = vsel %vm82_vm0, %v337_v6, 0  ;;  %v167_v8 = vld [vmem:[%s462_s2] sm:$0xff]  ;;  %v168_v9 = vld [vmem:[%s462_s2 + $0x8] sm:$0xff] }
   0x4   :  { %299 = vmatpush3.bf16.xpose.msra.mxu0 %v87_v5 }
   0x5   :  { %300 = vmatprep.subr.bf16.mxu0 %v370_v2 }
   0x6   :  { %159 = vperm.xlu0 %335, %v152_v4  }
   0x7   :  { %9 = vsyncpa [#allocation3], 0  ;;  %v325_v10 = vpack.c.bf16 %v168_v9, %v167_v8  ;;  %v338_v11 = vld [vmem:[%s461_s1 + $0x10] sm:$0xff]   ;;  %v339_v13 = vld [vmem:[%s461_s1 + $0x18] sm:$0xff]   ;;  %v153_v24 = vlaneseq  ;;  %vm169_vm2 = vcmask 130048  }
   0x8   :  { %v93_v12 = vsel %vm82_vm0, %v338_v11, 0  ;;  %v96_v14 = vsel %vm82_vm0, %v339_v13, 0  ;;  %v340_v15 = vld [vmem:[%s461_s1 + $0x20] sm:$0xff]   ;;  %v341_v17 = vld [vmem:[%s461_s1 + $0x28] sm:$0xff]   ;;  %v342_v19 = vld [vmem:[%s461_s1 + $0x30] sm:$0xff]  }
   0x9   :  { %326 = vmatprep.subr.bf16.mxu1 %v325_v10  ;;  %v99_v16 = vsel %vm82_vm0, %v340_v15, 0  ;;  %v102_v18 = vsel %vm82_vm0, %v341_v17, 0  ;;  %v105_v20 = vsel %vm82_vm0, %v342_v19, 0  ;;  %v343_v21 = vld [vmem:[%s461_s1 + $0x38] sm:$0xff]   ;;  %v344_v23 = vld [vmem:[%s460_s0] sm:$0xff]   ;;  %v154_v25 = vand.u32 127, %v153_v24 }
   0xa   :  { %328 = vmatpush3.bf16.msra.mxu1 %v325_v10  ;;  %v108_v22 = vsel %vm82_vm0, %v343_v21, 0  ;;  %s372_s1 = smov [#allocation2]  }
   0xb   :  { %s260_s13 = sshll.u32 %s372_s1, 4  ;;  %s261_s13 = int_to_ptr.vmem [resolvable:$true] %s260_s13 }
   0xc   :  { %301 = vmatpush3.bf16.xpose.msra.mxu0 %v90_v7  ;;  %s345_s0 = scalar_lea.vmem %s261_s13, 256  ;;  %p350_p1 = scmp.lt.s32.totalorder %s261_s13, %s261_s13 }
   0xd   :  { %302 = vmatprep.subr.bf16.mxu0 %v370_v2  ;;  %p346_p0 = scmp.ne.s32.totalorder %s261_s13, %s345_s0  ;;  %p351_p2 = scmp.lt.s32.totalorder %s345_s0, %s345_s0 }
   0xf   :  { %p352_p3 = por %p351_p2, %p350_p1 }
  0x11   :  { %p353_p4 = pnand %p352_p3, %p346_p0 }
  0x14   :  { %303 = vmatpush3.bf16.xpose.msra.mxu0 %v93_v12 }
  0x15   :  { %304 = vmatprep.subr.bf16.mxu0 %v370_v2 }
  0x1c   :  { %305 = vmatpush3.bf16.xpose.msra.mxu0 %v96_v14 }
  0x1d   :  { %306 = vmatprep.subr.bf16.mxu0 %v370_v2 }
  0x24   :  { %307 = vmatpush3.bf16.xpose.msra.mxu0 %v99_v16 }
  0x25   :  { %308 = vmatprep.subr.bf16.mxu0 %v370_v2 }
  0x2c   :  { %309 = vmatpush3.bf16.xpose.msra.mxu0 %v102_v18 }
  0x2d   :  { %310 = vmatprep.subr.bf16.mxu0 %v370_v2 }
  0x34   :  { %311 = vmatpush3.bf16.xpose.msra.mxu0 %v105_v20 }
  0x35   :  { %312 = vmatprep.subr.bf16.mxu0 %v370_v2 }
  0x3c   :  { %313 = vmatpush3.bf16.xpose.msra.mxu0 %v108_v22 }
  0x43   :  { %315 = vmatmul.mubr.msk.bf16.vlgmr.msra.gmra.mrb[0].mxu0 %vm82_vm0, %v344_v23 }
  0x81   :  { %v157_v26 = vpop.permute.xlu0 %156 }
  0x82   :  { %vm161_vm3 = vcmp.eq.s32.totalorder %v157_v26, %v154_v25 }
  0x83   :  { %v281_v27 = vsel %vm161_vm3, 1.0, %v370_v2 }
  0x84   :  { %322 = vmatprep.mubr.msk.f32.mxu1 %vm169_vm2, %v281_v27 }
  0x85   :  { %v160_v28 = vpop.permute.xlu0 %159 }
  0x86   :  { %vm162_vm4 = vcmp.eq.s32.totalorder %v160_v28, %v154_v25 }
  0x87   :  { %v282_v29 = vsel %vm162_vm4, 1.0, %v370_v2 }
  0x88   :  { %323 = vmatmul.mubr.msk.f32.vlgmr.msra.gmra.mrb[0].mxu1 %vm169_vm2, %v282_v29 }
 0x116   :  { %v144_v30 = vpop.f32.mrb[0].mxu0 }
 0x117   :  { %v316_v31 = vpop.f32.mrb[1].mxu0 }
 0x118   :  { %v147_v32 = vpop.f32.mrb[2].mxu0 }
 0x119   :  { %v317_v33 = vpop.f32.mrb[3].mxu0 }
 0x15b   :  { %v324_v34 = vpop.f32.mrb[0].mxu1 }
 0x15c   :  { %v252_v35 = vmul.f32 %v324_v34, %v147_v32  ;;  %v242_v36 = vpop.f32.mrb[1].mxu1 }
 0x15d   :  { %v251_v37 = vmul.f32 %v242_v36, %v144_v30 }
 0x15e   :  { %254 = vst [vmem:[#allocation2 + $0x8] sm:$0xff] %v252_v35 }
 0x15f   :  { %253 = vst [vmem:[#allocation2] sm:$0xff] %v251_v37 }
 0x160   :  { %356 = shalt.err (!%p353_p4)
}
 0x161   :  { %s357_s16 = scalar_lea.hbm %s464_s4, 256 }
 0x162   :  { %p358_p5 = scmp.ne.s32.totalorder %s464_s4, %s357_s16  ;;  %p361_p6 = scmp.lt.u32.totalorder %s357_s16, %s464_s4 }
 0x164   :  { %p363_p7 = pnand %p361_p6, %p358_p5 }
 0x166   :  { %366 = shalt.err (!%p363_p7)
}
 0x167   :  { %s373_s21 = smov 128   ;;  %s374_s22 = smov 8  }
 0x168   :  { %266 = dma.vmem_to_hbm [thread:$0]  %s261_s13, 256, %s464_s4, [#allocation3], %s373_s21, %s373_s21, %s374_s22  }
 0x169   :  { %367 = dma.done.wait [#allocation3], 256  }
 0x16a   :  { %368 = vsyncadd [#allocation3], 4294967040 }
 0x16b   :  { %270 = vsyncpa [#allocation3], 1 }

</bundles_post_ra>
